<compile_context>
chip_gen: v5e
topology: v5e:2x2
jax: 0.10.0
libtpu: 0.0.40
codegen_flags: <defaults>
</compile_context>

<pallas_src>
import functools

import jax
import jax.numpy as jnp
import numpy as np
from jax.experimental import pallas as pl
from jax.experimental.pallas import tpu as pltpu


def _round_up(x, m):
    return ((x + m - 1) // m) * m


# ---------------------------------------------------------------------------
# Pallas kernel: out[tm, tn] = x[tm, K] @ w[K, tn] + b[1, tn]
# (f32 accumulation on the MXU, f32 bias add, cast to output dtype at the end)
# ---------------------------------------------------------------------------
def _linear_kernel(x_ref, w_ref, b_ref, o_ref):
    acc = jnp.dot(x_ref[...], w_ref[...], preferred_element_type=jnp.float32)
    o_ref[...] = (acc + b_ref[...].astype(jnp.float32)).astype(o_ref.dtype)


def pallas_linear(x, w, b_f32, *, tm_max=512, tn_max=512):
    """out = x @ w + b   with x:(M,K), w:(K,N), b_f32:(1,N) float32.

    M and N are tiled (up to 512 each); edge tiles that do not divide evenly are
    handled by cdiv grids + Pallas boundary masking (no divisibility asserts).
    Output dtype follows x.dtype (bf16 supported; accumulation stays f32).
    """
    M, K = x.shape
    Kw, N = w.shape
    assert K == Kw
    assert b_f32.shape == (1, N)

    # M tile: full M if it fits one tile (block == full dim is always legal),
    # otherwise tm_max rows (multiple of 8) with a masked edge block.
    tm = M if M <= tm_max else _round_up(tm_max, 8)
    # N tile: full N if small, otherwise tn_max lanes (multiple of 128).
    tn = N if N <= tn_max else _round_up(tn_max, 128)

    grid = (pl.cdiv(M, tm), pl.cdiv(N, tn))

    return pl.pallas_call(
        _linear_kernel,
        out_shape=jax.ShapeDtypeStruct((M, N), x.dtype),
        grid_spec=pltpu.PrefetchScalarGridSpec(
            num_scalar_prefetch=0,
            grid=grid,
            in_specs=[
                pl.BlockSpec((tm, K), lambda i, j: (i, 0)),   # activations
                pl.BlockSpec((K, tn), lambda i, j: (0, j)),   # weight (N-tiled)
                pl.BlockSpec((1, tn), lambda i, j: (0, j)),   # bias (f32)
            ],
            out_specs=pl.BlockSpec((tm, tn), lambda i, j: (i, j)),
        ),
        compiler_params=pltpu.CompilerParams(
            dimension_semantics=("parallel", "parallel")),
    )(x, w, b_f32)


# ---------------------------------------------------------------------------
# One-time parameter preparation (hoisted out of the per-call forward path)
# ---------------------------------------------------------------------------
def prepare_params(params, patch_size, compute_dtype=jnp.float32):
    conv_w = params["conv_w"]             # (E, C, p, p)  PyTorch OIHW
    E, C, p, _ = conv_w.shape
    assert p == patch_size
    return {
        # GEMM-ready layouts, cast once to the compute dtype (e.g. bf16).
        "lin_wT": params["lin_w"].T.astype(compute_dtype),                 # (T, E)
        "conv_wT": conv_w.reshape(E, C * p * p).T.astype(compute_dtype),   # (C*p*p, E)
        # Biases stay float32: they are added to the f32 accumulator in-kernel.
        "lin_b": params["lin_b"].astype(jnp.float32).reshape(1, E),
        "conv_b": params["conv_b"].astype(jnp.float32).reshape(1, E),
    }


# ---------------------------------------------------------------------------
# Module forward (patchify glue in JAX, both projections on the Pallas GEMM)
# ---------------------------------------------------------------------------
@functools.partial(jax.jit, static_argnames=("patch_size",))
def cogvideox_patch_embed(text_embeds, image_embeds, prepared, patch_size):
    lin_wT = prepared["lin_wT"]
    conv_wT = prepared["conv_wT"]
    E = lin_wT.shape[1]
    cdt = lin_wT.dtype

    # ---- text projection: (B, S, T) @ lin_w.T + lin_b -> (B, S, E) ----
    B, S, T = text_embeds.shape
    t = pallas_linear(text_embeds.reshape(B * S, T).astype(cdt), lin_wT,
                      prepared["lin_b"])
    t = t.reshape(B, S, E)

    # ---- image projection: conv2d(kernel=stride=p) as patchify + GEMM ----
    Bi, F, C, H, W = image_embeds.shape
    assert Bi == B
    p = patch_size
    Hp, Wp = H // p, W // p
    x = image_embeds.reshape(B, F, C, Hp, p, Wp, p)
    x = x.transpose(0, 1, 3, 5, 2, 4, 6)               # (B, F, Hp, Wp, C, p, p)
    x = x.reshape(B * F * Hp * Wp, C * p * p).astype(cdt)
    img = pallas_linear(x, conv_wT, prepared["conv_b"])
    img = img.reshape(B, F * Hp * Wp, E)

    # TODO(synk): fuse this concat into the GEMM output writes (needs unaligned
    # row-offset output blocks or a manual DMA epilogue).
    return jnp.concatenate([t, img], axis=1)


# ---------------------------------------------------------------------------
# Pure-JAX reference (mirrors the PyTorch module exactly) for validation
# ---------------------------------------------------------------------------
def reference(text_embeds, image_embeds, params, patch_size):
    lin = jnp.einsum("bst,et->bse", text_embeds, params["lin_w"]) + params["lin_b"]
    B, F, C, H, W = image_embeds.shape
    x = image_embeds.reshape(B * F, C, H, W)
    y = jax.lax.conv_general_dilated(
        x, params["conv_w"], window_strides=(patch_size, patch_size),
        padding="VALID", dimension_numbers=("NCHW", "OIHW", "NCHW"))
    y = y + params["conv_b"][None, :, None, None]
    E = y.shape[1]
    y = y.reshape(B, F, E, -1).transpose(0, 1, 3, 2).reshape(B, -1, E)
    return jnp.concatenate([lin, y], axis=1)


if __name__ == "__main__":
    def make_case(key, B, F, C, H, W, S, E, T, p):
        ks = jax.random.split(key, 6)
        params = {
            "conv_w": jax.random.normal(ks[0], (E, C, p, p), jnp.float32) * 0.05,
            "conv_b": jax.random.normal(ks[1], (E,), jnp.float32) * 0.05,
            "lin_w": jax.random.normal(ks[2], (E, T), jnp.float32) * 0.05,
            "lin_b": jax.random.normal(ks[3], (E,), jnp.float32) * 0.05,
        }
        text = jax.random.normal(ks[4], (B, S, T), jnp.float32)
        image = jax.random.normal(ks[5], (B, F, C, H, W), jnp.float32)
        return params, text, image

    key = jax.random.PRNGKey(0)
    k1, k2 = jax.random.split(key)
    p = 2

    # --- Case 1: small, tile-divisible shapes, f32 compute path ---
    params, text, image = make_case(k1, B=2, F=2, C=4, H=16, W=16, S=8, E=32, T=64, p=p)
    prep = prepare_params(params, p, compute_dtype=jnp.float32)
    out = jax.block_until_ready(cogvideox_patch_embed(text, image, prep, patch_size=p))
    ref = jax.block_until_ready(reference(text, image, params, p))
    expected_seq = 8 + 2 * (16 // p) * (16 // p)
    assert out.shape == (2, expected_seq, 32), out.shape
    np.testing.assert_allclose(np.asarray(out), np.asarray(ref), rtol=1e-5, atol=1e-5)

    # --- Case 1b: bf16 compute path (f32 accumulate + f32 bias inside kernel) ---
    prep_bf16 = prepare_params(params, p, compute_dtype=jnp.bfloat16)
    out_bf16 = jax.block_until_ready(
        cogvideox_patch_embed(text, image, prep_bf16, patch_size=p))
    np.testing.assert_allclose(np.asarray(out_bf16, dtype=np.float32), np.asarray(ref),
                               rtol=3e-2, atol=3e-2)

    # --- Case 2: non-tile-divisible M and N (exercises cdiv + masked edge blocks) ---
    params2, text2, image2 = make_case(k2, B=2, F=2, C=4, H=36, W=36, S=13, E=640,
                                       T=64, p=p)
    prep2 = prepare_params(params2, p, compute_dtype=jnp.float32)
    out2 = jax.block_until_ready(
        cogvideox_patch_embed(text2, image2, prep2, patch_size=p))
    ref2 = jax.block_until_ready(reference(text2, image2, params2, p))
    assert out2.shape == ref2.shape, (out2.shape, ref2.shape)
    np.testing.assert_allclose(np.asarray(out2), np.asarray(ref2), rtol=1e-4, atol=1e-4)

    print("KERNEL_OK")
</pallas_src>

<mosaic_0001>
module attributes {stable_mosaic.version = 11 : i64} {
  func.func @_linear_kernel(%arg0: i32, %arg1: i32, %arg2: memref<256x16xf32, #tpu.memory_space<vmem>>, %arg3: memref<16x32xf32, #tpu.memory_space<vmem>>, %arg4: memref<1x32xf32, #tpu.memory_space<vmem>>, %arg5: memref<256x32xf32, #tpu.memory_space<vmem>>) attributes {dimension_semantics = [#tpu.dimension_semantics<parallel>, #tpu.dimension_semantics<parallel>], iteration_bounds = array<i64: 1, 1>, scalar_prefetch = 0 : i64, scratch_operands = 0 : i64, tpu.core_type = #tpu.core_type<tc>, window_params = [{transform_indices = @transform_0, window_bounds = array<i64: 256, 16>}, {transform_indices = @transform_1, window_bounds = array<i64: 16, 32>}, {transform_indices = @transform_2, window_bounds = array<i64: 1, 32>}, {transform_indices = @transform_3, window_bounds = array<i64: 256, 32>}]} {
    %c0 = arith.constant 0 : index
    %c0_0 = arith.constant 0 : index
    %0 = vector.load %arg2[%c0, %c0_0] : memref<256x16xf32, #tpu.memory_space<vmem>>, vector<256x16xf32>
    %c0_1 = arith.constant 0 : index
    %c0_2 = arith.constant 0 : index
    %1 = vector.load %arg3[%c0_1, %c0_2] : memref<16x32xf32, #tpu.memory_space<vmem>>, vector<16x32xf32>
    %cst = arith.constant dense<0.000000e+00> : vector<256x32xf32>
    %2 = tpu.matmul %0, %1, %cst {dimension_numbers = #tpu.dot_dimension_numbers<[1], [0], [0], [1], [0, 0, 1, 1], [], []>} : vector<256x16xf32>, vector<16x32xf32>, vector<256x32xf32> -> vector<256x32xf32>
    %c0_3 = arith.constant 0 : index
    %c0_4 = arith.constant 0 : index
    %3 = vector.load %arg4[%c0_3, %c0_4] : memref<1x32xf32, #tpu.memory_space<vmem>>, vector<1x32xf32>
    %4 = vector.broadcast %3 : vector<1x32xf32> to vector<256x32xf32>
    %5 = arith.addf %2, %4 : vector<256x32xf32>
    %c0_5 = arith.constant 0 : index
    %c0_6 = arith.constant 0 : index
    %6 = vector.load %arg5[%c0_5, %c0_6] : memref<256x32xf32, #tpu.memory_space<vmem>>, vector<256x32xf32>
    tpu.vector_store %arg5[%c0_5, %c0_6], %5 {strides = array<i32>} : memref<256x32xf32, #tpu.memory_space<vmem>>, vector<256x32xf32>,
    return
  }
  func.func @transform_0(%arg0: i32, %arg1: i32) -> (i32, i32) {
    %c0_i32 = arith.constant 0 : i32
    %c0_i32_0 = arith.constant 0 : i32
    return %arg0, %c0_i32 : i32, i32
  }
  func.func @transform_1(%arg0: i32, %arg1: i32) -> (i32, i32) {
    %c0_i32 = arith.constant 0 : i32
    %c0_i32_0 = arith.constant 0 : i32
    return %c0_i32, %arg1 : i32, i32
  }
  func.func @transform_2(%arg0: i32, %arg1: i32) -> (i32, i32) {
    %c0_i32 = arith.constant 0 : i32
    %c0_i32_0 = arith.constant 0 : i32
    return %c0_i32, %arg1 : i32, i32
  }
  func.func @transform_3(%arg0: i32, %arg1: i32) -> (i32, i32) {
    %c0_i32 = arith.constant 0 : i32
    return %arg0, %arg1 : i32, i32
  }
}

module attributes {stable_mosaic.version = 11 : i64} {
  func.func @_linear_kernel(%arg0: i32, %arg1: i32, %arg2: memref<16x64xf32, #tpu.memory_space<vmem>>, %arg3: memref<64x32xf32, #tpu.memory_space<vmem>>, %arg4: memref<1x32xf32, #tpu.memory_space<vmem>>, %arg5: memref<16x32xf32, #tpu.memory_space<vmem>>) attributes {dimension_semantics = [#tpu.dimension_semantics<parallel>, #tpu.dimension_semantics<parallel>], iteration_bounds = array<i64: 1, 1>, scalar_prefetch = 0 : i64, scratch_operands = 0 : i64, tpu.core_type = #tpu.core_type<tc>, window_params = [{transform_indices = @transform_0, window_bounds = array<i64: 16, 64>}, {transform_indices = @transform_1, window_bounds = array<i64: 64, 32>}, {transform_indices = @transform_2, window_bounds = array<i64: 1, 32>}, {transform_indices = @transform_3, window_bounds = array<i64: 16, 32>}]} {
    %c0 = arith.constant 0 : index
    %c0_0 = arith.constant 0 : index
    %0 = vector.load %arg2[%c0, %c0_0] : memref<16x64xf32, #tpu.memory_space<vmem>>, vector<16x64xf32>
    %c0_1 = arith.constant 0 : index
    %c0_2 = arith.constant 0 : index
    %1 = vector.load %arg3[%c0_1, %c0_2] : memref<64x32xf32, #tpu.memory_space<vmem>>, vector<64x32xf32>
    %cst = arith.constant dense<0.000000e+00> : vector<16x32xf32>
    %2 = tpu.matmul %0, %1, %cst {dimension_numbers = #tpu.dot_dimension_numbers<[1], [0], [0], [1], [0, 0, 1, 1], [], []>} : vector<16x64xf32>, vector<64x32xf32>, vector<16x32xf32> -> vector<16x32xf32>
    %c0_3 = arith.constant 0 : index
    %c0_4 = arith.constant 0 : index
    %3 = vector.load %arg4[%c0_3, %c0_4] : memref<1x32xf32, #tpu.memory_space<vmem>>, vector<1x32xf32>
    %4 = vector.broadcast %3 : vector<1x32xf32> to vector<16x32xf32>
    %5 = arith.addf %2, %4 : vector<16x32xf32>
    %c0_5 = arith.constant 0 : index
    %c0_6 = arith.constant 0 : index
    %6 = vector.load %arg5[%c0_5, %c0_6] : memref<16x32xf32, #tpu.memory_space<vmem>>, vector<16x32xf32>
    tpu.vector_store %arg5[%c0_5, %c0_6], %5 {strides = array<i32>} : memref<16x32xf32, #tpu.memory_space<vmem>>, vector<16x32xf32>,
    return
  }
  func.func @transform_0(%arg0: i32, %arg1: i32) -> (i32, i32) {
    %c0_i32 = arith.constant 0 : i32
    %c0_i32_0 = arith.constant 0 : i32
    return %arg0, %c0_i32 : i32, i32
  }
  func.func @transform_1(%arg0: i32, %arg1: i32) -> (i32, i32) {
    %c0_i32 = arith.constant 0 : i32
    %c0_i32_0 = arith.constant 0 : i32
    return %c0_i32, %arg1 : i32, i32
  }
  func.func @transform_2(%arg0: i32, %arg1: i32) -> (i32, i32) {
    %c0_i32 = arith.constant 0 : i32
    %c0_i32_0 = arith.constant 0 : i32
    return %c0_i32, %arg1 : i32, i32
  }
  func.func @transform_3(%arg0: i32, %arg1: i32) -> (i32, i32) {
    %c0_i32 = arith.constant 0 : i32
    return %arg0, %arg1 : i32, i32
  }
}

</mosaic_0001>

<bundles_post_ra>
// kernel: cogvideox_patch_embed.3
= control target key start
LH: loop header
LB: loop body
LE: loop exit
PB: predicated region body
PF: predicated region fallthrough
CT: control target
= control target key end

     0   :  { %vm52_vm0 = vcmask 130048   ;;  %vm262_vm1 = vcmask 261120   ;;  %s657_s1 = inlined_call_operand.vmem [shape: f32[16,32], index: 1, kind: input, shape index: {}]   ;;  %s658_s0 = inlined_call_operand.vmem [shape: f32[256,16], index: 0, kind: input, shape index: {}]   ;;  %s659_s2 = inlined_call_operand.vmem [shape: f32[1,32], index: 2, kind: input, shape index: {}]   ;;  %s660_s3 = inlined_call_operand.vmem [shape: f32[256,32], index: 3, kind: output, shape index: {}]  }
   0x1   :  { %v47_v0 = vld [vmem:[%s657_s1 + $0x8] sm:$0xff]  ;;  %v46_v1 = vld [vmem:[%s657_s1] sm:$0xff]  ;;  %v32_v10 = vld [vmem:[%s658_s0 + $0x90] sm:$0xff] }
   0x2   :  { %332 = vmatpush.msra.mxu2 %v47_v0  ;;  %333 = vmatpush.msra.mxu3 %v47_v0  ;;  %v30_v2 = vld [vmem:[%s658_s0 + $0x80] sm:$0xff]  ;;  %v31_v6 = vld [vmem:[%s658_s0 + $0x88] sm:$0xff]  ;;  %v40_v11 = vld [vmem:[%s658_s0 + $0xd0] sm:$0xff] }
   0x3   :  { %v38_v3 = vld [vmem:[%s658_s0 + $0xc0] sm:$0xff]  ;;  %163 = vmatpush.msra.mxu0 %v47_v0  ;;  %331 = vmatpush.msra.mxu1 %v47_v0  ;;  %v39_v7 = vld [vmem:[%s658_s0 + $0xc8] sm:$0xff]  ;;  %v16_v12 = vld [vmem:[%s658_s0 + $0x10] sm:$0xff] }
   0x4   :  { %335 = vmatpush.msra.mxu2 %v46_v1  ;;  %336 = vmatpush.msra.mxu3 %v46_v1  ;;  %v14_v4 = vld [vmem:[%s658_s0] sm:$0xff]  ;;  %v15_v8 = vld [vmem:[%s658_s0 + $0x8] sm:$0xff]  ;;  %v24_v13 = vld [vmem:[%s658_s0 + $0x50] sm:$0xff] }
   0x5   :  { %v22_v5 = vld [vmem:[%s658_s0 + $0x40] sm:$0xff]  ;;  %315 = vmatmul.msk.f32.vlgmr.msra.gmra.mxu2 %vm52_vm0, %v30_v2  ;;  %323 = vmatmul.msk.f32.vlgmr.msra.gmra.mxu3 %vm52_vm0, %v38_v3  ;;  %v23_v9 = vld [vmem:[%s658_s0 + $0x48] sm:$0xff]  ;;  %v33_v14 = vld [vmem:[%s658_s0 + $0x98] sm:$0xff] }
   0x6   :  { %164 = vmatpush.msra.mxu0 %v46_v1  ;;  %334 = vmatpush.msra.mxu1 %v46_v1  ;;  %v41_v15 = vld [vmem:[%s658_s0 + $0xd8] sm:$0xff]  ;;  %v34_v18 = vld [vmem:[%s658_s0 + $0xa0] sm:$0xff]  ;;  %v35_v22 = vld [vmem:[%s658_s0 + $0xa8] sm:$0xff] }
   0x7   :  { %299 = vmatmul.msk.f32.vlgmr.msra.gmra.mxu0 %vm52_vm0, %v14_v4  ;;  %307 = vmatmul.msk.f32.vlgmr.msra.gmra.mxu1 %vm52_vm0, %v22_v5  ;;  %v17_v16 = vld [vmem:[%s658_s0 + $0x18] sm:$0xff]  ;;  %v42_v19 = vld [vmem:[%s658_s0 + $0xe0] sm:$0xff]  ;;  %v43_v23 = vld [vmem:[%s658_s0 + $0xe8] sm:$0xff] }
   0x8   :  { %v25_v17 = vld [vmem:[%s658_s0 + $0x58] sm:$0xff]  ;;  %v18_v20 = vld [vmem:[%s658_s0 + $0x20] sm:$0xff]  ;;  %v19_v24 = vld [vmem:[%s658_s0 + $0x28] sm:$0xff] }
   0x9   :  { %v26_v21 = vld [vmem:[%s658_s0 + $0x60] sm:$0xff]  ;;  %v27_v25 = vld [vmem:[%s658_s0 + $0x68] sm:$0xff]  ;;  %v36_v26 = vld [vmem:[%s658_s0 + $0xb0] sm:$0xff] }
   0xa   :  { %v44_v27 = vld [vmem:[%s658_s0 + $0xf0] sm:$0xff]  ;;  %v37_v30 = vld [vmem:[%s658_s0 + $0xb8] sm:$0xff]  ;;  %v495_v34 = vld [vmem:[%s659_s2] ss:$0 sm:$0xff] }
   0xb   :  { %v20_v28 = vld [vmem:[%s658_s0 + $0x30] sm:$0xff]  ;;  %v45_v31 = vld [vmem:[%s658_s0 + $0xf8] sm:$0xff] }
   0xc   :  { %v28_v29 = vld [vmem:[%s658_s0 + $0x70] sm:$0xff]  ;;  %v21_v32 = vld [vmem:[%s658_s0 + $0x38] sm:$0xff] }
   0xd   :  { %316 = vmatmul.msk.f32.gmra.mxu2 %vm52_vm0, %v31_v6  ;;  %324 = vmatmul.msk.f32.gmra.mxu3 %vm52_vm0, %v39_v7  ;;  %v29_v33 = vld [vmem:[%s658_s0 + $0x78] sm:$0xff] }
   0xf   :  { %300 = vmatmul.msk.f32.gmra.mxu0 %vm52_vm0, %v15_v8  ;;  %308 = vmatmul.msk.f32.gmra.mxu1 %vm52_vm0, %v23_v9 }
  0x15   :  { %317 = vmatmul.msk.f32.gmra.mxu2 %vm52_vm0, %v32_v10  ;;  %325 = vmatmul.msk.f32.gmra.mxu3 %vm52_vm0, %v40_v11 }
  0x17   :  { %301 = vmatmul.msk.f32.gmra.mxu0 %vm52_vm0, %v16_v12  ;;  %309 = vmatmul.msk.f32.gmra.mxu1 %vm52_vm0, %v24_v13 }
  0x1d   :  { %318 = vmatmul.msk.f32.gmra.mxu2 %vm52_vm0, %v33_v14  ;;  %326 = vmatmul.msk.f32.gmra.mxu3 %vm52_vm0, %v41_v15 }
  0x1f   :  { %302 = vmatmul.msk.f32.gmra.mxu0 %vm52_vm0, %v17_v16  ;;  %310 = vmatmul.msk.f32.gmra.mxu1 %vm52_vm0, %v25_v17 }
  0x25   :  { %319 = vmatmul.msk.f32.gmra.mxu2 %vm52_vm0, %v34_v18  ;;  %327 = vmatmul.msk.f32.gmra.mxu3 %vm52_vm0, %v42_v19 }
  0x27   :  { %303 = vmatmul.msk.f32.gmra.mxu0 %vm52_vm0, %v18_v20  ;;  %311 = vmatmul.msk.f32.gmra.mxu1 %vm52_vm0, %v26_v21 }
  0x2d   :  { %320 = vmatmul.msk.f32.gmra.mxu2 %vm52_vm0, %v35_v22  ;;  %328 = vmatmul.msk.f32.gmra.mxu3 %vm52_vm0, %v43_v23 }
  0x2f   :  { %304 = vmatmul.msk.f32.gmra.mxu0 %vm52_vm0, %v19_v24  ;;  %312 = vmatmul.msk.f32.gmra.mxu1 %vm52_vm0, %v27_v25 }
  0x35   :  { %321 = vmatmul.msk.f32.gmra.mxu2 %vm52_vm0, %v36_v26  ;;  %329 = vmatmul.msk.f32.gmra.mxu3 %vm52_vm0, %v44_v27 }
  0x37   :  { %305 = vmatmul.msk.f32.gmra.mxu0 %vm52_vm0, %v20_v28  ;;  %313 = vmatmul.msk.f32.gmra.mxu1 %vm52_vm0, %v28_v29 }
  0x3d   :  { %322 = vmatmul.msk.f32.gmra.mxu2 %vm52_vm0, %v37_v30  ;;  %330 = vmatmul.msk.f32.gmra.mxu3 %vm52_vm0, %v45_v31 }
  0x3f   :  { %306 = vmatmul.msk.f32.gmra.mxu0 %vm52_vm0, %v21_v32  ;;  %314 = vmatmul.msk.f32.gmra.mxu1 %vm52_vm0, %v29_v33 }
  0x84   :  { %v166_v35 = vpop.f32.mrf.mxu0  ;;  %v190_v36 = vpop.f32.mrf.mxu1 }
  0x85   :  { %v167_v37 = vadd.f32 %v495_v34, %v166_v35  ;;  %v191_v38 = vadd.f32 %v495_v34, %v190_v36 }
  0x87   :  { %263 = vst.msk [vmem:[%s660_s3] sm:$0xff] %vm262_vm1, %v167_v37 }
  0x88   :  { %271 = vst.msk [vmem:[%s660_s3 + $0x40] sm:$0xff] %vm262_vm1, %v191_v38  ;;  %v214_v39 = vpop.f32.mrf.mxu2  ;;  %v238_v40 = vpop.f32.mrf.mxu3 }
  0x89   :  { %v215_v41 = vadd.f32 %v495_v34, %v214_v39  ;;  %v239_v42 = vadd.f32 %v495_v34, %v238_v40 }
  0x8b   :  { %279 = vst.msk [vmem:[%s660_s3 + $0x80] sm:$0xff] %vm262_vm1, %v215_v41 }
  0x8c   :  { %287 = vst.msk [vmem:[%s660_s3 + $0xc0] sm:$0xff] %vm262_vm1, %v239_v42  ;;  %v169_v43 = vpop.f32.mrf.mxu0  ;;  %v193_v44 = vpop.f32.mrf.mxu1 }
  0x8d   :  { %v170_v45 = vadd.f32 %v495_v34, %v169_v43  ;;  %v194_v46 = vadd.f32 %v495_v34, %v193_v44 }
  0x8f   :  { %264 = vst.msk [vmem:[%s660_s3 + $0x8] sm:$0xff] %vm262_vm1, %v170_v45 }
  0x90   :  { %272 = vst.msk [vmem:[%s660_s3 + $0x48] sm:$0xff] %vm262_vm1, %v194_v46  ;;  %v217_v47 = vpop.f32.mrf.mxu2  ;;  %v241_v48 = vpop.f32.mrf.mxu3 }
  0x91   :  { %v218_v49 = vadd.f32 %v495_v34, %v217_v47  ;;  %v242_v50 = vadd.f32 %v495_v34, %v241_v48 }
  0x93   :  { %280 = vst.msk [vmem:[%s660_s3 + $0x88] sm:$0xff] %vm262_vm1, %v218_v49 }
  0x94   :  { %288 = vst.msk [vmem:[%s660_s3 + $0xc8] sm:$0xff] %vm262_vm1, %v242_v50  ;;  %v172_v51 = vpop.f32.mrf.mxu0  ;;  %v196_v52 = vpop.f32.mrf.mxu1 }
  0x95   :  { %v173_v53 = vadd.f32 %v495_v34, %v172_v51  ;;  %v197_v54 = vadd.f32 %v495_v34, %v196_v52 }
  0x97   :  { %265 = vst.msk [vmem:[%s660_s3 + $0x10] sm:$0xff] %vm262_vm1, %v173_v53 }
  0x98   :  { %273 = vst.msk [vmem:[%s660_s3 + $0x50] sm:$0xff] %vm262_vm1, %v197_v54  ;;  %v220_v55 = vpop.f32.mrf.mxu2  ;;  %v244_v56 = vpop.f32.mrf.mxu3 }
  0x99   :  { %v221_v57 = vadd.f32 %v495_v34, %v220_v55  ;;  %v245_v58 = vadd.f32 %v495_v34, %v244_v56 }
  0x9b   :  { %281 = vst.msk [vmem:[%s660_s3 + $0x90] sm:$0xff] %vm262_vm1, %v221_v57 }
  0x9c   :  { %289 = vst.msk [vmem:[%s660_s3 + $0xd0] sm:$0xff] %vm262_vm1, %v245_v58  ;;  %v175_v59 = vpop.f32.mrf.mxu0  ;;  %v199_v60 = vpop.f32.mrf.mxu1 }
  0x9d   :  { %v176_v61 = vadd.f32 %v495_v34, %v175_v59  ;;  %v200_v62 = vadd.f32 %v495_v34, %v199_v60 }
  0x9f   :  { %266 = vst.msk [vmem:[%s660_s3 + $0x18] sm:$0xff] %vm262_vm1, %v176_v61 }
  0xa0   :  { %274 = vst.msk [vmem:[%s660_s3 + $0x58] sm:$0xff] %vm262_vm1, %v200_v62  ;;  %v223_v63 = vpop.f32.mrf.mxu2  ;;  %v247_v0 = vpop.f32.mrf.mxu3 }
  0xa1   :  { %v224_v1 = vadd.f32 %v495_v34, %v223_v63  ;;  %v248_v2 = vadd.f32 %v495_v34, %v247_v0 }
  0xa3   :  { %282 = vst.msk [vmem:[%s660_s3 + $0x98] sm:$0xff] %vm262_vm1, %v224_v1 }
  0xa4   :  { %290 = vst.msk [vmem:[%s660_s3 + $0xd8] sm:$0xff] %vm262_vm1, %v248_v2  ;;  %v178_v3 = vpop.f32.mrf.mxu0  ;;  %v202_v4 = vpop.f32.mrf.mxu1 }
  0xa5   :  { %v179_v5 = vadd.f32 %v495_v34, %v178_v3  ;;  %v203_v6 = vadd.f32 %v495_v34, %v202_v4 }
  0xa7   :  { %267 = vst.msk [vmem:[%s660_s3 + $0x20] sm:$0xff] %vm262_vm1, %v179_v5 }
  0xa8   :  { %275 = vst.msk [vmem:[%s660_s3 + $0x60] sm:$0xff] %vm262_vm1, %v203_v6  ;;  %v226_v7 = vpop.f32.mrf.mxu2  ;;  %v250_v8 = vpop.f32.mrf.mxu3 }
  0xa9   :  { %v227_v9 = vadd.f32 %v495_v34, %v226_v7  ;;  %v251_v10 = vadd.f32 %v495_v34, %v250_v8 }
  0xab   :  { %283 = vst.msk [vmem:[%s660_s3 + $0xa0] sm:$0xff] %vm262_vm1, %v227_v9 }
  0xac   :  { %291 = vst.msk [vmem:[%s660_s3 + $0xe0] sm:$0xff] %vm262_vm1, %v251_v10  ;;  %v181_v11 = vpop.f32.mrf.mxu0  ;;  %v205_v12 = vpop.f32.mrf.mxu1 }
  0xad   :  { %v182_v13 = vadd.f32 %v495_v34, %v181_v11  ;;  %v206_v14 = vadd.f32 %v495_v34, %v205_v12 }
  0xaf   :  { %268 = vst.msk [vmem:[%s660_s3 + $0x28] sm:$0xff] %vm262_vm1, %v182_v13 }
  0xb0   :  { %276 = vst.msk [vmem:[%s660_s3 + $0x68] sm:$0xff] %vm262_vm1, %v206_v14  ;;  %v229_v15 = vpop.f32.mrf.mxu2  ;;  %v253_v16 = vpop.f32.mrf.mxu3 }
  0xb1   :  { %v230_v17 = vadd.f32 %v495_v34, %v229_v15  ;;  %v254_v18 = vadd.f32 %v495_v34, %v253_v16 }
  0xb3   :  { %284 = vst.msk [vmem:[%s660_s3 + $0xa8] sm:$0xff] %vm262_vm1, %v230_v17 }
  0xb4   :  { %292 = vst.msk [vmem:[%s660_s3 + $0xe8] sm:$0xff] %vm262_vm1, %v254_v18  ;;  %v184_v19 = vpop.f32.mrf.mxu0  ;;  %v208_v20 = vpop.f32.mrf.mxu1 }
  0xb5   :  { %v185_v21 = vadd.f32 %v495_v34, %v184_v19  ;;  %v209_v22 = vadd.f32 %v495_v34, %v208_v20 }
  0xb7   :  { %269 = vst.msk [vmem:[%s660_s3 + $0x30] sm:$0xff] %vm262_vm1, %v185_v21 }
  0xb8   :  { %277 = vst.msk [vmem:[%s660_s3 + $0x70] sm:$0xff] %vm262_vm1, %v209_v22  ;;  %v232_v23 = vpop.f32.mrf.mxu2  ;;  %v256_v24 = vpop.f32.mrf.mxu3 }
  0xb9   :  { %v233_v25 = vadd.f32 %v495_v34, %v232_v23  ;;  %v257_v26 = vadd.f32 %v495_v34, %v256_v24 }
  0xbb   :  { %285 = vst.msk [vmem:[%s660_s3 + $0xb0] sm:$0xff] %vm262_vm1, %v233_v25 }
  0xbc   :  { %293 = vst.msk [vmem:[%s660_s3 + $0xf0] sm:$0xff] %vm262_vm1, %v257_v26  ;;  %v187_v27 = vpop.f32.mrf.mxu0  ;;  %v211_v28 = vpop.f32.mrf.mxu1 }
  0xbd   :  { %v188_v29 = vadd.f32 %v495_v34, %v187_v27  ;;  %v212_v30 = vadd.f32 %v495_v34, %v211_v28 }
  0xbf   :  { %270 = vst.msk [vmem:[%s660_s3 + $0x38] sm:$0xff] %vm262_vm1, %v188_v29 }
  0xc0   :  { %278 = vst.msk [vmem:[%s660_s3 + $0x78] sm:$0xff] %vm262_vm1, %v212_v30  ;;  %v235_v31 = vpop.f32.mrf.mxu2  ;;  %v259_v32 = vpop.f32.mrf.mxu3 }
  0xc1   :  { %v236_v33 = vadd.f32 %v495_v34, %v235_v31  ;;  %v260_v35 = vadd.f32 %v495_v34, %v259_v32 }
  0xc3   :  { %286 = vst.msk [vmem:[%s660_s3 + $0xb8] sm:$0xff] %vm262_vm1, %v236_v33 }
  0xc4   :  { %294 = vst.msk [vmem:[%s660_s3 + $0xf8] sm:$0xff] %vm262_vm1, %v260_v35 }

// kernel: cogvideox_patch_embed.2
= control target key start
LH: loop header
LB: loop body
LE: loop exit
PB: predicated region body
PF: predicated region fallthrough
CT: control target
= control target key end

     0   :  { %vm28_vm0 = vcmask 523264   ;;  %vm58_vm1 = vcmask 261120   ;;  %s135_s1 = inlined_call_operand.vmem [shape: f32[64,32], index: 1, kind: input, shape index: {}]   ;;  %s136_s2 = inlined_call_operand.vmem [shape: f32[1,32], index: 2, kind: input, shape index: {}]   ;;  %s137_s0 = inlined_call_operand.vmem [shape: f32[16,64], index: 0, kind: input, shape index: {}]   ;;  %s138_s3 = inlined_call_operand.vmem [shape: f32[16,32], index: 3, kind: output, shape index: {}]  }
   0x1   :  { %v23_v0 = vld [vmem:[%s135_s1 + $0x38] sm:$0xff]  ;;  %v22_v1 = vld [vmem:[%s135_s1 + $0x30] sm:$0xff]  ;;  %v21_v2 = vld [vmem:[%s135_s1 + $0x28] sm:$0xff] }
   0x2   :  { %43 = vmatpush.msra.mxu0 %v23_v0  ;;  %67 = vmatpush.msra.mxu1 %v23_v0  ;;  %v20_v3 = vld [vmem:[%s135_s1 + $0x20] sm:$0xff]  ;;  %v19_v4 = vld [vmem:[%s135_s1 + $0x18] sm:$0xff]  ;;  %v18_v5 = vld [vmem:[%s135_s1 + $0x10] sm:$0xff] }
   0x3   :  { %v17_v6 = vld [vmem:[%s135_s1 + $0x8] sm:$0xff]  ;;  %v16_v7 = vld [vmem:[%s135_s1] sm:$0xff] }
   0x4   :  { %44 = vmatpush.msra.mxu0 %v22_v1  ;;  %68 = vmatpush.msra.mxu1 %v22_v1  ;;  %v14_v8 = vld [vmem:[%s137_s0] sm:$0xff]  ;;  %v15_v9 = vld [vmem:[%s137_s0 + $0x8] sm:$0xff] }
   0x5   :  { %v75_v10 = vld [vmem:[%s136_s2] ss:$0 sm:$0xff] }
   0x6   :  { %45 = vmatpush.msra.mxu0 %v21_v2  ;;  %69 = vmatpush.msra.mxu1 %v21_v2 }
   0x8   :  { %46 = vmatpush.msra.mxu0 %v20_v3  ;;  %70 = vmatpush.msra.mxu1 %v20_v3 }
   0xa   :  { %47 = vmatpush.msra.mxu0 %v19_v4  ;;  %71 = vmatpush.msra.mxu1 %v19_v4 }
   0xc   :  { %48 = vmatpush.msra.mxu0 %v18_v5  ;;  %72 = vmatpush.msra.mxu1 %v18_v5 }
   0xe   :  { %49 = vmatpush.msra.mxu0 %v17_v6  ;;  %73 = vmatpush.msra.mxu1 %v17_v6 }
  0x10   :  { %50 = vmatpush.msra.mxu0 %v16_v7  ;;  %74 = vmatpush.msra.mxu1 %v16_v7 }
  0x11   :  { %65 = vmatmul.msk.f32.vlgmr.msra.gmra.mxu0 %vm28_vm0, %v14_v8  ;;  %66 = vmatmul.msk.f32.vlgmr.msra.gmra.mxu1 %vm28_vm0, %v15_v9 }
  0x8e   :  { %v52_v11 = vpop.f32.mrf.mxu0  ;;  %v55_v12 = vpop.f32.mrf.mxu1 }
  0x8f   :  { %v53_v13 = vadd.f32 %v75_v10, %v52_v11  ;;  %v56_v14 = vadd.f32 %v75_v10, %v55_v12 }
  0x91   :  { %59 = vst.msk [vmem:[%s138_s3] sm:$0xff] %vm58_vm1, %v53_v13 }
  0x92   :  { %60 = vst.msk [vmem:[%s138_s3 + $0x8] sm:$0xff] %vm58_vm1, %v56_v14 }

</bundles_post_ra>
